<compile_context>
chip_gen: v7x
topology: tpu7x:2x2x1
jax: 0.10.0
libtpu: 0.0.40
codegen_flags: <defaults>
</compile_context>

<pallas_src>
import jax
import jax.numpy as jnp
from jax.experimental import pallas as pl
from jax.experimental.pallas import tpu as pltpu


def _bow_kernel(w_ref, b_ref, bag_ref, sense_ref, o_ref):
    # w_ref:     (N, K)   linear weight, native nn.Linear (out, in) layout
    # b_ref:     (1, N)   linear bias as a lane-dense row
    # bag_ref:   (TM, K)  bag-of-words tile (K = 128, lane-dense)
    # sense_ref: (TM, N)  sense-vector tile
    # o_ref:     (TM, 1)  per-sample sigmoid(dot(W @ bag + b, sense))
    #
    # MXU: logits[m, n] = sum_k bag[m, k] * W[n, k]
    logits = jax.lax.dot_general(
        bag_ref[...], w_ref[...],
        dimension_numbers=(((1,), (1,)), ((), ())),
        preferred_element_type=jnp.float32)                    # (TM, N)
    # VPU: d[m] = sum_n sense[m, n] * (logits[m, n] + bias[n])
    d = jnp.sum(sense_ref[...] * (logits + b_ref[...]),
                axis=1, keepdims=True)                          # (TM, 1)
    # Numerically stable sigmoid: never exponentiates a positive argument.
    e = jnp.exp(-jnp.abs(d))                                    # EUP
    o_ref[...] = jnp.where(d >= 0.0, 1.0 / (1.0 + e), e / (1.0 + e))


def linear_regression_forward(x, weight, bias, *, output_size=64, tm=128):
    """Batched Pallas equivalent of LinearRegression.forward.

    x:      (M, input_size) float32 -- each row is one sample
    weight: (output_size, input_size - output_size)  (PyTorch nn.Linear layout)
    bias:   (output_size,)
    returns (M,) float32 = sigmoid(dot(W @ bag_m + b, sense_m)) per sample
    """
    m, input_size = x.shape
    in_features = input_size - output_size

    # TODO(synk): the original forward slices x[:-63] which is off-by-one vs.
    # the Linear's in_features (input_size - output_size); we use the
    # self-consistent split x[:, :in_features] / x[:, -output_size:].
    bag = x[:, :in_features]                 # (M, K)  lane-dense (K = 128)
    sense = x[:, -output_size:]              # (M, N)
    b_row = bias.reshape(1, output_size)     # (1, N)  lane-dense row

    # Pad the sample axis up to a multiple of the tile.
    grid_m = pl.cdiv(m, tm)
    m_pad = grid_m * tm
    if m_pad != m:
        bag = jnp.pad(bag, ((0, m_pad - m), (0, 0)))
        sense = jnp.pad(sense, ((0, m_pad - m), (0, 0)))

    out = pl.pallas_call(
        _bow_kernel,
        out_shape=jax.ShapeDtypeStruct((m_pad, 1), jnp.float32),
        grid=(grid_m,),
        in_specs=[
            # Weight / bias: same block every step -> DMA'd once, VMEM-resident.
            pl.BlockSpec((output_size, in_features), lambda i: (0, 0)),
            pl.BlockSpec((1, output_size), lambda i: (0, 0)),
            # Per-sample tiles marched along the grid.
            pl.BlockSpec((tm, in_features), lambda i: (i, 0)),
            pl.BlockSpec((tm, output_size), lambda i: (i, 0)),
        ],
        out_specs=pl.BlockSpec((tm, 1), lambda i: (i, 0)),
        compiler_params=pltpu.CompilerParams(
            dimension_semantics=("parallel",)),
    )(weight, b_row, bag, sense)
    return out[:m, 0]


if __name__ == "__main__":
    output_size = 64
    input_size = 192                       # -> in_features = 128 (lane-dense K)
    in_features = input_size - output_size
    batch = 256                            # 2 grid steps of TM=128

    key = jax.random.PRNGKey(0)
    kx, kw, kb = jax.random.split(key, 3)

    # Deterministic "nn.Linear"-style init: U(-1/sqrt(in), 1/sqrt(in)).
    bound = 1.0 / jnp.sqrt(jnp.float32(in_features))
    weight = jax.random.uniform(kw, (output_size, in_features),
                                minval=-bound, maxval=bound, dtype=jnp.float32)
    bias = jax.random.uniform(kb, (output_size,),
                              minval=-bound, maxval=bound, dtype=jnp.float32)
    x = jax.random.normal(kx, (batch, input_size), dtype=jnp.float32)

    out = linear_regression_forward(x, weight, bias, output_size=output_size)
    out = jax.block_until_ready(out)

    # Pure-JAX reference check (full f32 precision on the dots).
    bag = x[:, :in_features]
    sense = x[:, -output_size:]
    logits = jnp.dot(bag, weight.T, precision=jax.lax.Precision.HIGHEST) + bias
    ref = jax.nn.sigmoid(
        jnp.sum(logits * sense, axis=1))
    assert out.shape == (batch,), out.shape
    assert jnp.allclose(out, ref, atol=1e-5, rtol=1e-5), (out[:4], ref[:4])

    print("KERNEL_OK")
</pallas_src>

<mosaic_0001>
module attributes {stable_mosaic.version = 11 : i64} {
  func.func @_bow_kernel(%arg0: i32, %arg1: memref<64x128xf32, #tpu.memory_space<vmem>>, %arg2: memref<1x64xf32, #tpu.memory_space<vmem>>, %arg3: memref<128x128xf32, #tpu.memory_space<vmem>>, %arg4: memref<128x64xf32, #tpu.memory_space<vmem>>, %arg5: memref<128x1xf32, #tpu.memory_space<vmem>>) attributes {dimension_semantics = [#tpu.dimension_semantics<parallel>], iteration_bounds = array<i64: 2>, scalar_prefetch = 0 : i64, scratch_operands = 0 : i64, tpu.core_type = #tpu.core_type<tc>, window_params = [{pipeline_mode = #tpu.pipeline_mode<synchronous>, transform_indices = @transform_0, window_bounds = array<i64: 64, 128>}, {pipeline_mode = #tpu.pipeline_mode<synchronous>, transform_indices = @transform_1, window_bounds = array<i64: 1, 64>}, {transform_indices = @transform_2, window_bounds = array<i64: 128, 128>}, {transform_indices = @transform_3, window_bounds = array<i64: 128, 64>}, {transform_indices = @transform_4, window_bounds = array<i64: 128, 1>}]} {
    %c0 = arith.constant 0 : index
    %c0_0 = arith.constant 0 : index
    %0 = vector.load %arg3[%c0, %c0_0] : memref<128x128xf32, #tpu.memory_space<vmem>>, vector<128x128xf32>
    %c0_1 = arith.constant 0 : index
    %c0_2 = arith.constant 0 : index
    %1 = vector.load %arg1[%c0_1, %c0_2] : memref<64x128xf32, #tpu.memory_space<vmem>>, vector<64x128xf32>
    %cst = arith.constant dense<0.000000e+00> : vector<128x64xf32>
    %2 = tpu.matmul %0, %1, %cst {dimension_numbers = #tpu.dot_dimension_numbers<[1], [1], [0], [0], [0, 0, 1, 0], [], []>} : vector<128x128xf32>, vector<64x128xf32>, vector<128x64xf32> -> vector<128x64xf32>
    %c0_3 = arith.constant 0 : index
    %c0_4 = arith.constant 0 : index
    %3 = vector.load %arg4[%c0_3, %c0_4] : memref<128x64xf32, #tpu.memory_space<vmem>>, vector<128x64xf32>
    %c0_5 = arith.constant 0 : index
    %c0_6 = arith.constant 0 : index
    %4 = vector.load %arg2[%c0_5, %c0_6] : memref<1x64xf32, #tpu.memory_space<vmem>>, vector<1x64xf32>
    %5 = vector.broadcast %4 : vector<1x64xf32> to vector<128x64xf32>
    %6 = arith.addf %2, %5 : vector<128x64xf32>
    %7 = arith.mulf %3, %6 : vector<128x64xf32>
    %cst_7 = arith.constant dense<0.000000e+00> : vector<128xf32>
    %8 = vector.multi_reduction <add>, %7, %cst_7 [1] : vector<128x64xf32> to vector<128xf32>
    %9 = vector.shape_cast %8 : vector<128xf32> to vector<128x1xf32>
    %10 = math.absf %9 : vector<128x1xf32>
    %cst_8 = arith.constant 0.000000e+00 : f32
    %11 = vector.broadcast %cst_8 : f32 to vector<128x1xf32>
    %12 = arith.subf %11, %10 : vector<128x1xf32>
    %13 = math.exp %12 : vector<128x1xf32>
    %cst_9 = arith.constant 0.000000e+00 : f32
    %14 = vector.broadcast %cst_9 : f32 to vector<128x1xf32>
    %15 = arith.cmpf oge, %9, %14 : vector<128x1xf32>
    %cst_10 = arith.constant 1.000000e+00 : f32
    %16 = vector.broadcast %cst_10 : f32 to vector<128x1xf32>
    %17 = arith.addf %16, %13 : vector<128x1xf32>
    %cst_11 = arith.constant 1.000000e+00 : f32
    %18 = vector.broadcast %cst_11 : f32 to vector<128x1xf32>
    %19 = arith.divf %18, %17 : vector<128x1xf32>
    %cst_12 = arith.constant 1.000000e+00 : f32
    %20 = vector.broadcast %cst_12 : f32 to vector<128x1xf32>
    %21 = arith.addf %20, %13 : vector<128x1xf32>
    %22 = arith.divf %13, %21 : vector<128x1xf32>
    %23 = arith.select %15, %19, %22 : vector<128x1xi1>, vector<128x1xf32>
    %c0_13 = arith.constant 0 : index
    %c0_14 = arith.constant 0 : index
    %24 = vector.load %arg5[%c0_13, %c0_14] : memref<128x1xf32, #tpu.memory_space<vmem>>, vector<128x1xf32>
    tpu.vector_store %arg5[%c0_13, %c0_14], %23 {strides = array<i32>} : memref<128x1xf32, #tpu.memory_space<vmem>>, vector<128x1xf32>,
    return
  }
  func.func @transform_0(%arg0: i32) -> (i32, i32) {
    %c0_i32 = arith.constant 0 : i32
    %c0_i32_0 = arith.constant 0 : i32
    %c0_i32_1 = arith.constant 0 : i32
    return %c0_i32, %c0_i32_0 : i32, i32
  }
  func.func @transform_1(%arg0: i32) -> (i32, i32) {
    %c0_i32 = arith.constant 0 : i32
    %c0_i32_0 = arith.constant 0 : i32
    %c0_i32_1 = arith.constant 0 : i32
    return %c0_i32, %c0_i32_0 : i32, i32
  }
  func.func @transform_2(%arg0: i32) -> (i32, i32) {
    %c0_i32 = arith.constant 0 : i32
    %c0_i32_0 = arith.constant 0 : i32
    return %arg0, %c0_i32 : i32, i32
  }
  func.func @transform_3(%arg0: i32) -> (i32, i32) {
    %c0_i32 = arith.constant 0 : i32
    %c0_i32_0 = arith.constant 0 : i32
    return %arg0, %c0_i32 : i32, i32
  }
  func.func @transform_4(%arg0: i32) -> (i32, i32) {
    %c0_i32 = arith.constant 0 : i32
    %c0_i32_0 = arith.constant 0 : i32
    return %arg0, %c0_i32 : i32, i32
  }
}

</mosaic_0001>

<bundles_post_ra>
// kernel: tpu_custom_call.1
= control target key start
LH: loop header
LB: loop body
LE: loop exit
PB: predicated region body
PF: predicated region fallthrough
CT: control target
= control target key end

     0   :  { %s932_s15 = smov 0   ;;  %s1172_s0 = inlined_call_operand.vmem [shape: f32[64,128], index: 0, kind: input, shape index: {}]   ;;  %s1173_s1 = inlined_call_operand.vmem [shape: f32[1,64], index: 1, kind: input, shape index: {}]   ;;  %s1174_s2 = inlined_call_operand.vmem [shape: f32[256,128], index: 2, kind: input, shape index: {}]   ;;  %s1175_s3 = inlined_call_operand.vmem [shape: f32[256,64], index: 3, kind: input, shape index: {}]   ;;  %s1176_s4 = inlined_call_operand.vmem [shape: f32[256,1], index: 4, kind: output, shape index: {}]  }
   0x1 LB: > { %s725_s16 = sadd.s32 4294967295, %s905_s15   ;;  %p729_p0 = scmp.ge.s32.totalorder %s905_s15, 1  ;;  %s905_s15 = sphi %s932_s15, %s14_s15  }
   0x2   : > { %p174_p1 = scmp.lt.s32.totalorder %s905_s15, 3 }
   0x4   : > { %p175_p2 = pnand %p729_p0, %p174_p1 }
   0x5   : > { %v239_v0 = vld [vmem:[%s1172_s0] sm:$0xff] (!%p175_p2)  ;;  %v240_v1 = vld [vmem:[%s1172_s0 + $0x8] sm:$0xff] (!%p175_p2)  ;;  %v241_v2 = vld [vmem:[%s1172_s0 + $0x10] sm:$0xff] (!%p175_p2)  ;;  %s730_s23 = sshll.u32 (!%p175_p2), %s725_s16, 4  ;;  %vm431_vm0 = vcmask (!%p175_p2), 523264   ;;  %vm640_vm1 = vcmask (!%p175_p2), 7168  }
   0x6   : > { %178 = sbr.rel (%p175_p2) target bundleno = 465 (0x1d1), region = 36  ;;  %v803_v3 = vpack.c.bf16 (!%p175_p2), %v240_v1, %v239_v0  ;;  %v242_v4 = vld [vmem:[%s1172_s0 + $0x18] sm:$0xff] (!%p175_p2)  ;;  %p206_p3 = scmp.lt.s32.totalorder (!%p175_p2), %s730_s23, 31  ;;  %v243_v6 = vld [vmem:[%s1172_s0 + $0x20] sm:$0xff] (!%p175_p2)  ;;  %v244_v7 = vld [vmem:[%s1172_s0 + $0x28] sm:$0xff] (!%p175_p2) }
   0x7   : > { %v807_v5 = vpack.c.bf16 (!%p175_p2), %v242_v4, %v241_v2  ;;  %v811_v10 = vpack.c.bf16 (!%p175_p2), %v244_v7, %v243_v6  ;;  %v245_v11 = vld [vmem:[%s1172_s0 + $0x30] sm:$0xff] (!%p175_p2)  ;;  %v246_v12 = vld [vmem:[%s1172_s0 + $0x38] sm:$0xff] (!%p175_p2)  ;;  %v997_v28 = vld [vmem:[%s1173_s1] ss:$0 sm:$0xff] (!%p175_p2) }
   0x8   : > { %804 = vmatprep.subr.bf16.mxu0 (!%p175_p2), %v803_v3  ;;  %819 = vmatprep.subr.bf16.mxu1 (!%p175_p2), %v803_v3  ;;  %v815_v13 = vpack.c.bf16 (!%p175_p2), %v246_v12, %v245_v11 }
   0x9   : > { %806 = vmatpush3.bf16.xpose.msra.mxu0 (!%p175_p2), %v803_v3  ;;  %823 = vmatpush3.bf16.xpose.msra.mxu1 (!%p175_p2), %v803_v3 }
   0xa   : > { %808 = vmatprep.subr.bf16.mxu0 (!%p175_p2), %v807_v5  ;;  %820 = vmatprep.subr.bf16.mxu1 (!%p175_p2), %v807_v5 }
   0xd   : > { %s1178_s23 = smov (!%p206_p3, %s730_s23), 31 }
   0xe   : > { %s952_s26 = sshll.u32 %s1178_s23, 3 }
   0xf   : > { %s964_s7 = scalar_lea.vmem %s1174_s2, %s952_s26  ;;  %s992_s14 = scalar_lea.vmem %s1175_s3, %s952_s26 }
  0x10   : > { %v223_v8 = vld [vmem:[%s964_s7] sm:$0xff]  ;;  %v224_v14 = vld [vmem:[%s964_s7 + $0x8] sm:$0xff]  ;;  %v225_v16 = vld [vmem:[%s964_s7 + $0x10] sm:$0xff]  ;;  %s1114_s20 = scalar_lea.vmem %s1176_s4, %s952_s26 }
  0x11   : > { %v231_v9 = vld [vmem:[%s964_s7 + $0x40] sm:$0xff]  ;;  %779 = vmatprep.mubr.f32.mxu0 %v223_v8  ;;  %810 = vmatpush3.bf16.xpose.msra.mxu0 %v807_v5  ;;  %v232_v15 = vld [vmem:[%s964_s7 + $0x48] sm:$0xff]  ;;  %v233_v17 = vld [vmem:[%s964_s7 + $0x50] sm:$0xff] }
  0x12   : > { %791 = vmatprep.mubr.f32.mxu1 %v231_v9  ;;  %824 = vmatpush3.bf16.xpose.msra.mxu1 %v807_v5  ;;  %v226_v18 = vld [vmem:[%s964_s7 + $0x18] sm:$0xff]  ;;  %v227_v20 = vld [vmem:[%s964_s7 + $0x20] sm:$0xff]  ;;  %v228_v22 = vld [vmem:[%s964_s7 + $0x28] sm:$0xff] }
  0x13   : > { %812 = vmatprep.subr.bf16.mxu0 %v811_v10  ;;  %821 = vmatprep.subr.bf16.mxu1 %v811_v10  ;;  %v234_v19 = vld [vmem:[%s964_s7 + $0x58] sm:$0xff]  ;;  %v235_v21 = vld [vmem:[%s964_s7 + $0x60] sm:$0xff]  ;;  %v236_v23 = vld [vmem:[%s964_s7 + $0x68] sm:$0xff] }
  0x14   : > { %v229_v24 = vld [vmem:[%s964_s7 + $0x30] sm:$0xff]  ;;  %v230_v26 = vld [vmem:[%s964_s7 + $0x38] sm:$0xff]  ;;  %v256_v31 = vld [vmem:[%s992_s14 + $0x48] sm:$0xff] }
  0x15   : > { %v237_v25 = vld [vmem:[%s964_s7 + $0x70] sm:$0xff]  ;;  %v238_v27 = vld [vmem:[%s964_s7 + $0x78] sm:$0xff]  ;;  %v248_v32 = vld [vmem:[%s992_s14 + $0x8] sm:$0xff] }
  0x16   : > { %v247_v37 = vld [vmem:[%s992_s14] sm:$0xff]  ;;  %v250_v44 = vld [vmem:[%s992_s14 + $0x18] sm:$0xff]  ;;  %v249_v1 = vld [vmem:[%s992_s14 + $0x10] sm:$0xff] }
  0x17   : > { %v258_v46 = vld [vmem:[%s992_s14 + $0x58] sm:$0xff]  ;;  %v255_v53 = vld [vmem:[%s992_s14 + $0x40] sm:$0xff]  ;;  %v257_v2 = vld [vmem:[%s992_s14 + $0x50] sm:$0xff] }
  0x18   : > { %v252_v7 = vld [vmem:[%s992_s14 + $0x28] sm:$0xff]  ;;  %v251_v8 = vld [vmem:[%s992_s14 + $0x20] sm:$0xff] }
  0x19   : > { %814 = vmatpush3.bf16.xpose.msra.mxu0 %v811_v10 }
  0x1a   : > { %825 = vmatpush3.bf16.xpose.msra.mxu1 %v811_v10  ;;  %816 = vmatprep.subr.bf16.mxu0 %v815_v13 }
  0x1b   : > { %822 = vmatprep.subr.bf16.mxu1 %v815_v13 }
  0x21   : > { %818 = vmatpush3.bf16.xpose.msra.mxu0 %v815_v13 }
  0x22   : > { %826 = vmatpush3.bf16.xpose.msra.mxu1 %v815_v13 }
  0x28   : > { %780 = vmatmul.mubr.f32.vlgmr.msra.gmra.mrb[0].mxu0 %v224_v14 }
  0x29   : > { %792 = vmatmul.mubr.f32.vlgmr.msra.gmra.mrb[0].mxu1 %v232_v15  ;;  %782 = vmatprep.mubr.f32.mxu0 %v225_v16 }
  0x2a   : > { %794 = vmatprep.mubr.f32.mxu1 %v233_v17 }
  0x2c   : > { %783 = vmatmul.mubr.f32.gmra.mrb[2].mxu0 %v226_v18 }
  0x2d   : > { %795 = vmatmul.mubr.f32.gmra.mrb[2].mxu1 %v234_v19  ;;  %785 = vmatprep.mubr.f32.mxu0 %v227_v20  ;;  %v260_v19 = vld [vmem:[%s992_s14 + $0x68] sm:$0xff]  ;;  %v259_v20 = vld [vmem:[%s992_s14 + $0x60] sm:$0xff] }
  0x2e   : > { %797 = vmatprep.mubr.f32.mxu1 %v235_v21 }
  0x30   : > { %786 = vmatmul.mubr.f32.gmra.mrb[4].mxu0 %v228_v22 }
  0x31   : > { %798 = vmatmul.mubr.f32.gmra.mrb[4].mxu1 %v236_v23  ;;  %788 = vmatprep.mubr.f32.mxu0 %v229_v24 }
  0x32   : > { %800 = vmatprep.mubr.f32.mxu1 %v237_v25 }
  0x34   : > { %789 = vmatmul.mubr.f32.gmra.mrb[6].mxu0 %v230_v26 }
  0x35   : > { %801 = vmatmul.mubr.f32.gmra.mrb[6].mxu1 %v238_v27 }
  0xfb   : > { %v781_v29 = vpop.f32.mrb[0].mxu0 }
  0xfc   : > { %v793_v30 = vpop.f32.mrb[0].mxu1  ;;  %v342_v33 = vadd.f32 %v781_v29, %v997_v28  ;;  %v336_v35 = vpop.f32.mrb[1].mxu0 }
  0xfd   : > { %v382_v34 = vadd.f32 %v793_v30, %v997_v28  ;;  %v376_v36 = vpop.f32.mrb[1].mxu1  ;;  %v337_v38 = vadd.f32 %v997_v28, %v336_v35  ;;  %v254_v30 = vld [vmem:[%s992_s14 + $0x38] sm:$0xff] }
  0xfe   : > { %v416_v40 = vmul.f32 %v342_v33, %v248_v32  ;;  %v377_v41 = vadd.f32 %v997_v28, %v376_v36 }
  0xff   : > { %v424_v39 = vmul.f32 %v382_v34, %v256_v31  ;;  %v784_v42 = vpop.f32.mrb[2].mxu0  ;;  %v415_v45 = vmul.f32 %v337_v38, %v247_v37  ;;  %v253_v31 = vld [vmem:[%s992_s14 + $0x30] sm:$0xff]  ;;  %v262_v38 = vld [vmem:[%s992_s14 + $0x78] sm:$0xff] }
 0x100   : > { %v796_v43 = vpop.f32.mrb[2].mxu1  ;;  %v352_v47 = vadd.f32 %v784_v42, %v997_v28  ;;  %v346_v48 = vpop.f32.mrb[3].mxu0  ;;  %v435_v50 = vsel %vm431_vm0, %v416_v40, 0.0  ;;  %v423_v57 = vmul.f32 %v377_v41, %v255_v53 }
 0x101   : > { %v459_v49 = vsel %vm431_vm0, %v424_v39, 0.0  ;;  %v392_v51 = vadd.f32 %v796_v43, %v997_v28  ;;  %v386_v52 = vpop.f32.mrb[3].mxu1  ;;  %436 = vadd.xlane.f32.xlu0 %v435_v50  ;;  %v347_v59 = vadd.f32 %v997_v28, %v346_v48  ;;  %v432_v62 = vsel %vm431_vm0, %v415_v45, 0.0  ;;  %v261_v39 = vld [vmem:[%s992_s14 + $0x70] sm:$0xff] }
 0x102   : > { %460 = vadd.xlane.f32.xlu1 %v459_v49  ;;  %v418_v54 = vmul.f32 %v352_v47, %v250_v44  ;;  %v387_v60 = vadd.f32 %v997_v28, %v386_v52  ;;  %v456_v10 = vsel %vm431_vm0, %v423_v57, 0.0 }
 0x103   : > { %v426_v55 = vmul.f32 %v392_v51, %v258_v46  ;;  %v787_v56 = vpop.f32.mrb[4].mxu0  ;;  %v417_v11 = vmul.f32 %v347_v59, %v249_v1 }
 0x104   : > { %v799_v58 = vpop.f32.mrb[4].mxu1  ;;  %v441_v61 = vsel %vm431_vm0, %v418_v54, 0.0  ;;  %v356_v63 = vpop.f32.mrb[5].mxu0  ;;  %v362_v4 = vadd.f32 %v787_v56, %v997_v28  ;;  %v425_v12 = vmul.f32 %v387_v60, %v257_v2 }
 0x105   : > { %v396_v0 = vpop.f32.mrb[5].mxu1  ;;  %433 = vadd.xlane.f32.xlu0 %v432_v62  ;;  %v465_v3 = vsel %vm431_vm0, %v426_v55, 0.0  ;;  %v357_v5 = vadd.f32 %v997_v28, %v356_v63  ;;  %v402_v15 = vadd.f32 %v799_v58, %v997_v28  ;;  %v438_v21 = vsel %vm431_vm0, %v417_v11, 0.0 }
 0x106   : > { %442 = vadd.xlane.f32.xlu1 %v441_v61  ;;  %v397_v16 = vadd.f32 %v997_v28, %v396_v0  ;;  %v420_v17 = vmul.f32 %v362_v4, %v252_v7  ;;  %v462_v22 = vsel %vm431_vm0, %v425_v12, 0.0 }
 0x107   : > { %v790_v6 = vpop.f32.mrb[6].mxu0  ;;  %v419_v18 = vmul.f32 %v357_v5, %v251_v8  ;;  %v428_v23 = vmul.f32 %v402_v15, %v260_v19 }
 0x108   : > { %v802_v9 = vpop.f32.mrb[6].mxu1  ;;  %v366_v13 = vpop.f32.mrb[7].mxu0  ;;  %v427_v24 = vmul.f32 %v397_v16, %v259_v20  ;;  %v372_v25 = vadd.f32 %v790_v6, %v997_v28  ;;  %v447_v26 = vsel %vm431_vm0, %v420_v17, 0.0 }
 0x109   : > { %v406_v14 = vpop.f32.mrb[7].mxu1  ;;  %457 = vadd.xlane.f32.xlu0 %v456_v10  ;;  %v444_v27 = vsel %vm431_vm0, %v419_v18, 0.0  ;;  %v367_v29 = vadd.f32 %v997_v28, %v366_v13  ;;  %v412_v32 = vadd.f32 %v802_v9, %v997_v28  ;;  %v471_v33 = vsel %vm431_vm0, %v428_v23, 0.0 }
 0x10a   : > { %466 = vadd.xlane.f32.xlu1 %v465_v3  ;;  %v468_v34 = vsel %vm431_vm0, %v427_v24, 0.0  ;;  %v407_v35 = vadd.f32 %v997_v28, %v406_v14  ;;  %v422_v36 = vmul.f32 %v372_v25, %v254_v30 }
 0x10b   : > { %v421_v37 = vmul.f32 %v367_v29, %v253_v31  ;;  %v430_v42 = vmul.f32 %v412_v32, %v262_v38 }
 0x10c   : > { %v453_v40 = vsel %vm431_vm0, %v422_v36, 0.0  ;;  %v429_v43 = vmul.f32 %v407_v35, %v261_v39 }
 0x10d   : > { %463 = vadd.xlane.f32.xlu0 %v462_v22  ;;  %v450_v41 = vsel %vm431_vm0, %v421_v37, 0.0  ;;  %v477_v44 = vsel %vm431_vm0, %v430_v42, 0.0 }
 0x10e   : > { %439 = vadd.xlane.f32.xlu1 %v438_v21  ;;  %v474_v45 = vsel %vm431_vm0, %v429_v43, 0.0 }
 0x111   : > { %445 = vadd.xlane.f32.xlu0 %v444_v27 }
 0x112   : > { %448 = vadd.xlane.f32.xlu1 %v447_v26 }
 0x115   : > { %469 = vadd.xlane.f32.xlu0 %v468_v34 }
 0x116   : > { %472 = vadd.xlane.f32.xlu1 %v471_v33 }
 0x119   : > { %451 = vadd.xlane.f32.xlu0 %v450_v41 }
 0x11a   : > { %454 = vadd.xlane.f32.xlu1 %v453_v40 }
 0x11d   : > { %475 = vadd.xlane.f32.xlu0 %v474_v45 }
 0x11e   : > { %478 = vadd.xlane.f32.xlu1 %v477_v44 }
 0x18e   : > { %v1049_v46 = vpop.xlane.xlu0 %436 }
 0x18f   : > { %v1047_v28 = vpop.xlane.xlu1 %460  ;;  %v481_v48 = vand.u32 2147483647, %v1049_v46  ;;  %vm545_vm3 = vcmp.ge.f32.partialorder %v1049_v46, 0.0 }
 0x190   : > { %v489_v47 = vand.u32 2147483647, %v1047_v28  ;;  %vm553_vm2 = vcmp.ge.f32.partialorder %v1047_v28, 0.0 }
 0x191   : > { %v497_v50 = vsub.f32 0.0, %v481_v48 }
 0x192   : > { %v505_v49 = vsub.f32 0.0, %v489_v47  ;;  %v1055_v52 = vpop.xlane.xlu0 %433 }
 0x193   : > { %v1053_v51 = vpop.xlane.xlu1 %442  ;;  %v514_v54 = vmul.f32 1.442695, %v497_v50  ;;  %v480_v56 = vand.u32 2147483647, %v1055_v52  ;;  %vm544_vm5 = vcmp.ge.f32.partialorder %v1055_v52, 0.0 }
 0x194   : > { %v530_v53 = vmul.f32 1.442695, %v505_v49  ;;  %v483_v55 = vand.u32 2147483647, %v1053_v51  ;;  %vm547_vm4 = vcmp.ge.f32.partialorder %v1053_v51, 0.0 }
 0x195   : > { %v496_v58 = vsub.f32 0.0, %v480_v56 }
 0x196   : > { %835 = vpow2.f32 %v530_v53  ;;  %v499_v57 = vsub.f32 0.0, %v483_v55  ;;  %v1061_v60 = vpop.xlane.xlu0 %457 }
 0x197   : > { %837 = vpow2.f32 %v514_v54  ;;  %v1059_v59 = vpop.xlane.xlu1 %466  ;;  %v512_v63 = vmul.f32 1.442695, %v496_v58  ;;  %v488_v0 = vand.u32 2147483647, %v1061_v60  ;;  %vm552_vm7 = vcmp.ge.f32.partialorder %v1061_v60, 0.0 }
 0x198   : > { %v518_v61 = vmul.f32 1.442695, %v499_v57  ;;  %v491_v62 = vand.u32 2147483647, %v1059_v59  ;;  %vm555_vm6 = vcmp.ge.f32.partialorder %v1059_v59, 0.0 }
 0x199   : > { %v504_v2 = vsub.f32 0.0, %v488_v0 }
 0x19a   : > { %839 = vpow2.f32 %v518_v61  ;;  %v507_v1 = vsub.f32 0.0, %v491_v62  ;;  %v1067_v4 = vpop.xlane.xlu0 %463 }
 0x19b   : > { %841 = vpow2.f32 %v512_v63  ;;  %v1065_v3 = vpop.xlane.xlu1 %439  ;;  %v528_v7 = vmul.f32 1.442695, %v504_v2  ;;  %v490_v8 = vand.u32 2147483647, %v1067_v4  ;;  %vm554_vm9 = vcmp.ge.f32.partialorder %v1067_v4, 0.0 }
 0x19c   : > { %v534_v5 = vmul.f32 1.442695, %v507_v1  ;;  %v482_v6 = vand.u32 2147483647, %v1065_v3  ;;  %vm546_vm8 = vcmp.ge.f32.partialorder %v1065_v3, 0.0 }
 0x19d   : > { %v506_v10 = vsub.f32 0.0, %v490_v8 }
 0x19e   : > { %843 = vpow2.f32 %v534_v5  ;;  %v498_v9 = vsub.f32 0.0, %v482_v6  ;;  %v1073_v12 = vpop.xlane.xlu0 %445 }
 0x19f   : > { %845 = vpow2.f32 %v528_v7  ;;  %v1071_v11 = vpop.xlane.xlu1 %448  ;;  %v532_v18 = vmul.f32 1.442695, %v506_v10  ;;  %v484_v19 = vand.u32 2147483647, %v1073_v12  ;;  %vm548_vm11 = vcmp.ge.f32.partialorder %v1073_v12, 0.0 }
 0x1a0   : > { %v836_v13 = vpop.eup %835  ;;  %v516_v14 = vmul.f32 1.442695, %v498_v9  ;;  %v485_v15 = vand.u32 2147483647, %v1071_v11  ;;  %vm549_vm10 = vcmp.ge.f32.partialorder %v1071_v11, 0.0 }
 0x1a1   : > { %v838_v16 = vpop.eup %837  ;;  %v569_v17 = vadd.f32 1.0, %v836_v13  ;;  %v500_v22 = vsub.f32 0.0, %v484_v19 }
 0x1a2   : > { %v561_v20 = vadd.f32 1.0, %v838_v16  ;;  %847 = vpow2.f32 %v516_v14  ;;  %v501_v21 = vsub.f32 0.0, %v485_v15  ;;  %v1079_v24 = vpop.xlane.xlu0 %469 }
 0x1a3   : > { %849 = vrcp.f32 %v569_v17  ;;  %v1077_v23 = vpop.xlane.xlu1 %472  ;;  %v520_v31 = vmul.f32 1.442695, %v500_v22  ;;  %v492_v32 = vand.u32 2147483647, %v1079_v24  ;;  %vm556_vm13 = vcmp.ge.f32.partialorder %v1079_v24, 0.0 }
 0x1a4   : > { %v1081_v25 = vpop.eup %839  ;;  %851 = vrcp.f32 %v561_v20  ;;  %v522_v26 = vmul.f32 1.442695, %v501_v21  ;;  %v493_v27 = vand.u32 2147483647, %v1077_v23  ;;  %vm557_vm12 = vcmp.ge.f32.partialorder %v1077_v23, 0.0 }
 0x1a5   : > { %v1084_v29 = vpop.eup %841  ;;  %v563_v30 = vadd.f32 1.0, %v1081_v25  ;;  %853 = vpow2.f32 %v532_v18  ;;  %v508_v35 = vsub.f32 0.0, %v492_v32 }
 0x1a6   : > { %v560_v33 = vadd.f32 1.0, %v1084_v29  ;;  %855 = vpow2.f32 %v522_v26  ;;  %v509_v34 = vsub.f32 0.0, %v493_v27  ;;  %v1091_v37 = vpop.xlane.xlu0 %451 }
 0x1a7   : > { %857 = vrcp.f32 %v563_v30  ;;  %v1089_v36 = vpop.xlane.xlu1 %454  ;;  %v536_v43 = vmul.f32 1.442695, %v508_v35  ;;  %v486_v44 = vand.u32 2147483647, %v1091_v37  ;;  %vm550_vm15 = vcmp.ge.f32.partialorder %v1091_v37, 0.0 }
 0x1a8   : > { %v1093_v38 = vpop.eup %843  ;;  %859 = vrcp.f32 %v560_v33  ;;  %v538_v39 = vmul.f32 1.442695, %v509_v34  ;;  %v487_v40 = vand.u32 2147483647, %v1089_v36  ;;  %vm551_vm14 = vcmp.ge.f32.partialorder %v1089_v36, 0.0 }
 0x1a9   : > { %v1096_v41 = vpop.eup %845  ;;  %v571_v42 = vadd.f32 1.0, %v1093_v38  ;;  %861 = vpow2.f32 %v520_v31  ;;  %v502_v48 = vsub.f32 0.0, %v486_v44 }
 0x1aa   : > { %v568_v45 = vadd.f32 1.0, %v1096_v41  ;;  %863 = vpow2.f32 %v538_v39  ;;  %v503_v47 = vsub.f32 0.0, %v487_v40  ;;  %v1103_v50 = vpop.xlane.xlu0 %475 }
 0x1ab   : > { %865 = vrcp.f32 %v571_v42  ;;  %v1101_v49 = vpop.xlane.xlu1 %478  ;;  %v524_v58 = vmul.f32 1.442695, %v502_v48  ;;  %v494_v61 = vand.u32 2147483647, %v1103_v50 }
 0x1ac   : > { %v1105_v53 = vpop.eup %847  ;;  %867 = vrcp.f32 %v568_v45  ;;  %v526_v54 = vmul.f32 1.442695, %v503_v47  ;;  %v495_v55 = vand.u32 2147483647, %v1101_v49  ;;  %vm559_vm0 = vcmp.ge.f32.partialorder %v1101_v49, 0.0 }
 0x1ad   : > { %v850_v56 = vpop.eup %849  ;;  %v562_v57 = vadd.f32 1.0, %v1105_v53  ;;  %869 = vpow2.f32 %v536_v43  ;;  %v510_v5 = vsub.f32 0.0, %v494_v61 }
 0x1ae   : > { %v852_v62 = vpop.eup %851  ;;  %v617_v63 = vmul.f32 %v850_v56, %v836_v13  ;;  %871 = vpow2.f32 %v526_v54  ;;  %v511_v0 = vsub.f32 0.0, %v495_v55 }
 0x1af   : > { %v854_v1 = vpop.eup %853  ;;  %v609_v2 = vmul.f32 %v852_v62, %v838_v16  ;;  %873 = vrcp.f32 %v562_v57  ;;  %v540_v13 = vmul.f32 1.442695, %v510_v5 }
 0x1b0   : > { %v856_v6 = vpop.eup %855  ;;  %v633_v7 = vsel %vm553_vm2, %v850_v56, %v617_v63  ;;  %v570_v8 = vadd.f32 1.0, %v854_v1  ;;  %875 = vpow2.f32 %v524_v58  ;;  %v542_v9 = vmul.f32 1.442695, %v511_v0 }
 0x1b1   : > { %v858_v10 = vpop.eup %857  ;;  %650 = vst.msk [vmem:[%s1114_s20 + $0x48] sm:$0xff] %vm640_vm1, %v633_v7  ;;  %v625_v14 = vsel %vm545_vm3, %v852_v62, %v609_v2  ;;  %v565_v28 = vadd.f32 1.0, %v856_v6  ;;  %vm558_vm2 = vcmp.ge.f32.partialorder %v1103_v50, 0.0 }
 0x1b2   : > { %v860_v15 = vpop.eup %859  ;;  %642 = vst.msk [vmem:[%s1114_s20 + $0x8] sm:$0xff] %vm640_vm1, %v625_v14  ;;  %v611_v46 = vmul.f32 %v858_v10, %v1081_v25  ;;  %877 = vrcp.f32 %v570_v8 }
 0x1b3   : > { %v862_v16 = vpop.eup %861  ;;  %v608_v17 = vmul.f32 %v860_v15, %v1084_v29  ;;  %879 = vrcp.f32 %v565_v28 }
 0x1b4   : > { %v864_v18 = vpop.eup %863  ;;  %v627_v19 = vsel %vm547_vm4, %v858_v10, %v611_v46  ;;  %v564_v20 = vadd.f32 1.0, %v862_v16  ;;  %881 = vpow2.f32 %v542_v9 }
 0x1b5   : > { %v866_v21 = vpop.eup %865  ;;  %644 = vst.msk [vmem:[%s1114_s20 + $0x18] sm:$0xff] %vm640_vm1, %v627_v19  ;;  %v624_v22 = vsel %vm544_vm5, %v860_v15, %v608_v17  ;;  %v573_v25 = vadd.f32 1.0, %v864_v18  ;;  %883 = vpow2.f32 %v540_v13 }
 0x1b6   : > { %v868_v26 = vpop.eup %867  ;;  %641 = vst.msk [vmem:[%s1114_s20] sm:$0xff] %vm640_vm1, %v624_v22  ;;  %v619_v51 = vmul.f32 %v866_v21, %v1093_v38  ;;  %885 = vrcp.f32 %v564_v20 }
 0x1b7   : > { %v870_v27 = vpop.eup %869  ;;  %v616_v52 = vmul.f32 %v868_v26, %v1096_v41  ;;  %887 = vrcp.f32 %v573_v25 }
 0x1b8   : > { %v872_v29 = vpop.eup %871  ;;  %v635_v30 = vsel %vm555_vm6, %v866_v21, %v619_v51  ;;  %v572_v31 = vadd.f32 1.0, %v870_v27 }
 0x1b9   : > { %v874_v32 = vpop.eup %873  ;;  %652 = vst.msk [vmem:[%s1114_s20 + $0x58] sm:$0xff] %vm640_vm1, %v635_v30  ;;  %v632_v33 = vsel %vm552_vm7, %v868_v26, %v616_v52  ;;  %v567_v34 = vadd.f32 1.0, %v872_v29 }
 0x1ba   : > { %v876_v35 = vpop.eup %875  ;;  %649 = vst.msk [vmem:[%s1114_s20 + $0x40] sm:$0xff] %vm640_vm1, %v632_v33  ;;  %v610_v38 = vmul.f32 %v874_v32, %v1105_v53  ;;  %889 = vrcp.f32 %v572_v31 }
 0x1bb   : > { %891 = vrcp.f32 %v567_v34  ;;  %v566_v59 = vadd.f32 1.0, %v876_v35 }
 0x1bc   : > { %v878_v39 = vpop.eup %877  ;;  %v626_v60 = vsel %vm546_vm8, %v874_v32, %v610_v38 }
 0x1bd   : > { %v880_v40 = vpop.eup %879  ;;  %643 = vst.msk [vmem:[%s1114_s20 + $0x10] sm:$0xff] %vm640_vm1, %v626_v60  ;;  %v618_v41 = vmul.f32 %v878_v39, %v854_v1  ;;  %893 = vrcp.f32 %v566_v59 }
 0x1be   : > { %v882_v42 = vpop.eup %881  ;;  %v613_v43 = vmul.f32 %v880_v40, %v856_v6 }
 0x1bf   : > { %v884_v44 = vpop.eup %883  ;;  %v634_v45 = vsel %vm554_vm9, %v878_v39, %v618_v41  ;;  %v575_v3 = vadd.f32 1.0, %v882_v42 }
 0x1c0   : > { %v886_v47 = vpop.eup %885  ;;  %651 = vst.msk [vmem:[%s1114_s20 + $0x50] sm:$0xff] %vm640_vm1, %v634_v45  ;;  %v629_v48 = vsel %vm549_vm10, %v880_v40, %v613_v43  ;;  %v574_v53 = vadd.f32 1.0, %v884_v44 }
 0x1c1   : > { %v888_v54 = vpop.eup %887  ;;  %646 = vst.msk [vmem:[%s1114_s20 + $0x28] sm:$0xff] %vm640_vm1, %v629_v48  ;;  %v612_v55 = vmul.f32 %v886_v47, %v862_v16  ;;  %895 = vrcp.f32 %v575_v3 }
 0x1c2   : > { %v621_v4 = vmul.f32 %v888_v54, %v864_v18  ;;  %897 = vrcp.f32 %v574_v53 }
 0x1c3   : > { %v628_v56 = vsel %vm548_vm11, %v886_v47, %v612_v55 }
 0x1c4   : > { %v890_v11 = vpop.eup %889  ;;  %645 = vst.msk [vmem:[%s1114_s20 + $0x20] sm:$0xff] %vm640_vm1, %v628_v56  ;;  %v637_v57 = vsel %vm557_vm12, %v888_v54, %v621_v4 }
 0x1c5   : > { %v892_v58 = vpop.eup %891  ;;  %654 = vst.msk [vmem:[%s1114_s20 + $0x68] sm:$0xff] %vm640_vm1, %v637_v57  ;;  %v620_v61 = vmul.f32 %v890_v11, %v870_v27 }
 0x1c6   : > { %v615_v62 = vmul.f32 %v892_v58, %v872_v29 }
 0x1c7   : > { %v894_v12 = vpop.eup %893  ;;  %v636_v63 = vsel %vm556_vm13, %v890_v11, %v620_v61 }
 0x1c8   : > { %653 = vst.msk [vmem:[%s1114_s20 + $0x60] sm:$0xff] %vm640_vm1, %v636_v63  ;;  %v631_v23 = vsel %vm551_vm14, %v892_v58, %v615_v62  ;;  %v614_v0 = vmul.f32 %v894_v12, %v876_v35 }
 0x1c9   : > { %648 = vst.msk [vmem:[%s1114_s20 + $0x38] sm:$0xff] %vm640_vm1, %v631_v23 }
 0x1ca   : > { %v630_v1 = vsel %vm550_vm15, %v894_v12, %v614_v0 }
 0x1cb   : > { %v896_v2 = vpop.eup %895  ;;  %647 = vst.msk [vmem:[%s1114_s20 + $0x30] sm:$0xff] %vm640_vm1, %v630_v1 }
 0x1cc   : > { %v898_v24 = vpop.eup %897  ;;  %v623_v5 = vmul.f32 %v896_v2, %v882_v42 }
 0x1cd   : > { %v622_v6 = vmul.f32 %v898_v24, %v884_v44 }
 0x1ce   : > { %v639_v7 = vsel %vm559_vm0, %v896_v2, %v623_v5 }
 0x1cf   : > { %656 = vst.msk [vmem:[%s1114_s20 + $0x78] sm:$0xff] %vm640_vm1, %v639_v7  ;;  %v638_v36 = vsel %vm558_vm2, %v898_v24, %v622_v6 }
 0x1d0   : > { %655 = vst.msk [vmem:[%s1114_s20 + $0x70] sm:$0xff] %vm640_vm1, %v638_v36 }
 0x1d1 PF: > { %s14_s15 = sadd.s32 1, %s905_s15  }
 0x1d2   : > { %p11_p4 = scmp.ge.s32.totalorder %s14_s15, 4  }
 0x1d4   :  { %13 = sbr.rel (!%p11_p4) target bundleno = 1 (0x1), region = 69 }

</bundles_post_ra>
